<compile_context>
chip_gen: v7x
topology: tpu7x:2x2x1
jax: 0.10.0
libtpu: 0.0.40
codegen_flags: <defaults>
</compile_context>

<pallas_src>
import jax
import jax.numpy as jnp
from jax.experimental import pallas as pl
from jax.experimental.pallas import tpu as pltpu

_LANES = 128  # lane-dense output row width


def _violation_loss_kernel(labels_ref, center_ref, errors_ref, out_ref, acc_ref):
    # labels_ref : SMEM (B,)   int32   (scalar-prefetch, runtime labels)
    # center_ref : VMEM (1, 1, C)
    # errors_ref : VMEM (1, TK, C)
    # out_ref    : VMEM (1, 1, _LANES) lane-dense per-example output row
    # acc_ref    : VMEM (1, C) f32     accumulator for per-class upper bound
    b = pl.program_id(0)
    k = pl.program_id(1)
    nk = pl.num_programs(1)

    label = labels_ref[b]  # runtime scalar (no recompile per label)

    # Accumulate in f32 even if inputs become bf16 (v5e has no bf16 VALU path;
    # free on v6e/v7x since VALU is nowhere near the bottleneck here).
    e = errors_ref[0].astype(jnp.float32)                       # (TK, C)
    C = e.shape[-1]

    lane_ids = jax.lax.broadcasted_iota(jnp.int32, (1, C), 1)   # (1, C)
    is_true = lane_ids == label                                 # (1, C) lane mask

    @pl.when(k == 0)
    def _init():
        # Fold the center violation (c - c[label]) into the accumulator init.
        c = center_ref[0].astype(jnp.float32)                   # (1, C)
        c_true = jnp.sum(jnp.where(is_true, c, 0.0), axis=-1, keepdims=True)
        acc_ref[...] = c - c_true

    # e_true[k] = e[k, label] extracted via masked lane-sum (data-independent
    # shape, no cross-lane dynamic gather).
    e_true = jnp.sum(jnp.where(is_true, e, 0.0), axis=-1, keepdims=True)   # (TK, 1)
    acc_ref[...] += jnp.sum(jnp.abs(e - e_true), axis=0, keepdims=True)    # (1, C)

    @pl.when(k == nk - 1)
    def _finalize():
        loss = jnp.sum(jnp.maximum(acc_ref[...], 0.0))                     # scalar
        # Broadcast across all 128 lanes -> unmasked full-row vst.
        out_ref[...] = jnp.broadcast_to(loss, out_ref.shape).astype(out_ref.dtype)


def _choose_k_tiling(K, cap):
    """Pick (tk, kp): tile size (mult. of 8, <= cap) and padded K (mult. of tk).

    Splits K into ceil(K/cap) near-equal tiles so zero-padding is at most 8
    rows per tile (instead of up to a whole tile), avoiding a near-2x padded
    copy of `errors` when K is just above the cap.
    """
    k8 = -(-K // 8) * 8
    if k8 <= cap:
        return k8, k8
    n = -(-k8 // cap)                       # number of K tiles
    tk = -(-(-(-k8 // n)) // 8) * 8         # ceil(k8/n) rounded up to mult of 8
    return tk, n * tk


def batched_violation_loss(centers, errors, labels, *, max_k_tile=2048):
    """centers: [B, C], errors: [B, K, C], labels: [B] int -> [B] f32 losses."""
    B, C = centers.shape
    _, K, _ = errors.shape

    tk, kp = _choose_k_tiling(K, max_k_tile)
    if kp != K:
        # Zero rows are exact no-ops: their true-label entry is also zero, so
        # |0 - 0| contributes nothing to the violation upper bound.
        errors = jnp.pad(errors, ((0, 0), (0, kp - K), (0, 0)))

    centers3 = centers.reshape(B, 1, C)
    labels = labels.astype(jnp.int32)

    out = pl.pallas_call(
        _violation_loss_kernel,
        out_shape=jax.ShapeDtypeStruct((B, 1, _LANES), jnp.float32),
        grid_spec=pltpu.PrefetchScalarGridSpec(
            num_scalar_prefetch=1,          # labels -> SMEM, runtime value
            grid=(B, kp // tk),             # (batch, K-reduction)
            in_specs=[
                pl.BlockSpec((1, 1, C), lambda b, k, lbl: (b, 0, 0)),
                pl.BlockSpec((1, tk, C), lambda b, k, lbl: (b, k, 0)),
            ],
            out_specs=pl.BlockSpec((1, 1, _LANES), lambda b, k, lbl: (b, 0, 0)),
            scratch_shapes=[pltpu.VMEM((1, C), jnp.float32)],
        ),
        compiler_params=pltpu.CompilerParams(
            dimension_semantics=("parallel", "arbitrary")),
    )(labels, centers3, errors)
    return out[:, 0, 0]


def z_sum_of_max_individual_violations(center, errors, true_label, nb_classes=10):
    """Single-example wrapper matching the PyTorch module: scalar f32 loss."""
    center = jnp.asarray(center).reshape(1, nb_classes)
    errors = jnp.asarray(errors)[None]                              # (1, K, C)
    label = jnp.asarray(true_label, dtype=jnp.int32).reshape(1)     # runtime scalar
    return batched_violation_loss(center, errors, label)[0]


if __name__ == "__main__":
    # plain-JAX reference (same math as the PyTorch module)
    def ref_one(c, e, lbl):
        c_v = c - c[lbl]
        e_v = e - e[:, lbl][:, None]
        upper = c_v + jnp.sum(jnp.abs(e_v), axis=0)
        return jnp.sum(jnp.maximum(upper, 0.0))

    nb_classes = 10      # logit vector length (MNIST-style)
    key = jax.random.PRNGKey(0)

    # --- case 1: single K-tile path (B=2, K=32) ---------------------------
    k_c, k_e, k_c2, k_e2 = jax.random.split(key, 4)
    batch, n_error_terms = 2, 32
    centers = jax.random.normal(k_c, (batch, nb_classes), dtype=jnp.float32)
    errors = 0.1 * jax.random.normal(
        k_e, (batch, n_error_terms, nb_classes), dtype=jnp.float32)
    labels = jnp.array([3, 7], dtype=jnp.int32)

    losses = batched_violation_loss(centers, errors, labels)
    jax.block_until_ready(losses)
    refs = jnp.stack([ref_one(centers[i], errors[i], int(labels[i]))
                      for i in range(batch)])
    assert jnp.allclose(losses, refs, rtol=1e-5, atol=1e-5), (losses, refs)

    single = z_sum_of_max_individual_violations(centers[0], errors[0], 3, nb_classes)
    jax.block_until_ready(single)
    assert jnp.allclose(single, refs[0], rtol=1e-5, atol=1e-5), (single, refs[0])

    # --- case 2: multi K-tile + K-padding path (B=3, K=37, tiny tile) ------
    batch2, k2 = 3, 37
    centers2 = jax.random.normal(k_c2, (batch2, nb_classes), dtype=jnp.float32)
    errors2 = 0.1 * jax.random.normal(
        k_e2, (batch2, k2, nb_classes), dtype=jnp.float32)
    labels2 = jnp.array([0, 5, 9], dtype=jnp.int32)

    losses2 = batched_violation_loss(centers2, errors2, labels2, max_k_tile=16)
    jax.block_until_ready(losses2)
    refs2 = jnp.stack([ref_one(centers2[i], errors2[i], int(labels2[i]))
                       for i in range(batch2)])
    assert jnp.allclose(losses2, refs2, rtol=1e-5, atol=1e-5), (losses2, refs2)

    print("KERNEL_OK")
</pallas_src>

<mosaic_0001>
module attributes {stable_mosaic.version = 11 : i64} {
  func.func @_violation_loss_kernel(%arg0: i32, %arg1: i32, %arg2: memref<2xi32, #tpu.memory_space<smem>>, %arg3: memref<1x1x10xf32, #tpu.memory_space<vmem>>, %arg4: memref<1x32x10xf32, #tpu.memory_space<vmem>>, %arg5: memref<1x1x128xf32, #tpu.memory_space<vmem>>, %arg6: memref<1x10xf32, #tpu.memory_space<vmem>>) attributes {dimension_semantics = [#tpu.dimension_semantics<parallel>, #tpu.dimension_semantics<arbitrary>], iteration_bounds = array<i64: 2, 1>, scalar_prefetch = 1 : i64, scratch_operands = 1 : i64, tpu.core_type = #tpu.core_type<tc>, window_params = [{transform_indices = @transform_0, window_bounds = array<i64: 1, 1, 10>}, {transform_indices = @transform_1, window_bounds = array<i64: 1, 32, 10>}, {transform_indices = @transform_2, window_bounds = array<i64: 1, 1, 128>}]} {
    %0 = arith.index_cast %arg0 : i32 to index
    %1 = memref.load %arg2[%0] : memref<2xi32, #tpu.memory_space<smem>>
    %c0 = arith.constant 0 : index
    %c0_0 = arith.constant 0 : index
    %c0_1 = arith.constant 0 : index
    %2 = vector.load %arg4[%c0, %c0_0, %c0_1] : memref<1x32x10xf32, #tpu.memory_space<vmem>>, vector<1x32x10xf32>
    %3 = vector.shape_cast %2 : vector<1x32x10xf32> to vector<32x10xf32>
    %4 = tpu.iota {dimensions = array<i32: 1>} : vector<1x10xi32>
    %5 = vector.broadcast %1 : i32 to vector<1x10xi32>
    %6 = arith.cmpi eq, %4, %5 : vector<1x10xi32>
    %c0_i32 = arith.constant 0 : i32
    %7 = arith.cmpi eq, %arg1, %c0_i32 : i32
    %8 = arith.extui %7 : i1 to i32
    %c0_i32_2 = arith.constant 0 : i32
    %9 = arith.cmpi ne, %8, %c0_i32_2 : i32
    scf.if %9 {
      %c0_11 = arith.constant 0 : index
      %c0_12 = arith.constant 0 : index
      %c0_13 = arith.constant 0 : index
      %27 = vector.load %arg3[%c0_11, %c0_12, %c0_13] : memref<1x1x10xf32, #tpu.memory_space<vmem>>, vector<1x1x10xf32>
      %28 = vector.shape_cast %27 : vector<1x1x10xf32> to vector<1x10xf32>
      %cst_14 = arith.constant 0.000000e+00 : f32
      %29 = vector.broadcast %cst_14 : f32 to vector<1x10xf32>
      %30 = arith.select %6, %28, %29 : vector<1x10xi1>, vector<1x10xf32>
      %cst_15 = arith.constant dense<0.000000e+00> : vector<1xf32>
      %31 = vector.multi_reduction <add>, %30, %cst_15 [1] : vector<1x10xf32> to vector<1xf32>
      %32 = vector.shape_cast %31 : vector<1xf32> to vector<1x1xf32>
      %33 = vector.broadcast %32 : vector<1x1xf32> to vector<1x10xf32>
      %34 = arith.subf %28, %33 : vector<1x10xf32>
      %c0_16 = arith.constant 0 : index
      %c0_17 = arith.constant 0 : index
      %35 = vector.load %arg6[%c0_16, %c0_17] : memref<1x10xf32, #tpu.memory_space<vmem>>, vector<1x10xf32>
      tpu.vector_store %arg6[%c0_16, %c0_17], %34 {strides = array<i32>} : memref<1x10xf32, #tpu.memory_space<vmem>>, vector<1x10xf32>,
    } else {
    }
    %cst = arith.constant 0.000000e+00 : f32
    %10 = vector.shape_cast %6 : vector<1x10xi1> to vector<1x10xi1>
    %11 = vector.broadcast %10 : vector<1x10xi1> to vector<32x10xi1>
    %12 = vector.broadcast %cst : f32 to vector<32x10xf32>
    %13 = arith.select %11, %3, %12 : vector<32x10xi1>, vector<32x10xf32>
    %cst_3 = arith.constant dense<0.000000e+00> : vector<32xf32>
    %14 = vector.multi_reduction <add>, %13, %cst_3 [1] : vector<32x10xf32> to vector<32xf32>
    %15 = vector.shape_cast %14 : vector<32xf32> to vector<32x1xf32>
    %c0_4 = arith.constant 0 : index
    %c0_5 = arith.constant 0 : index
    %16 = vector.load %arg6[%c0_4, %c0_5] : memref<1x10xf32, #tpu.memory_space<vmem>>, vector<1x10xf32>
    %17 = vector.broadcast %15 : vector<32x1xf32> to vector<32x10xf32>
    %18 = arith.subf %3, %17 : vector<32x10xf32>
    %19 = math.absf %18 : vector<32x10xf32>
    %cst_6 = arith.constant dense<0.000000e+00> : vector<10xf32>
    %20 = vector.multi_reduction <add>, %19, %cst_6 [0] : vector<32x10xf32> to vector<10xf32>
    %21 = vector.shape_cast %20 : vector<10xf32> to vector<1x10xf32>
    %22 = arith.addf %16, %21 : vector<1x10xf32>
    %c0_7 = arith.constant 0 : index
    %c0_8 = arith.constant 0 : index
    %23 = vector.load %arg6[%c0_7, %c0_8] : memref<1x10xf32, #tpu.memory_space<vmem>>, vector<1x10xf32>
    tpu.vector_store %arg6[%c0_7, %c0_8], %22 {strides = array<i32>} : memref<1x10xf32, #tpu.memory_space<vmem>>, vector<1x10xf32>,
    %c0_i32_9 = arith.constant 0 : i32
    %24 = arith.cmpi eq, %arg1, %c0_i32_9 : i32
    %25 = arith.extui %24 : i1 to i32
    %c0_i32_10 = arith.constant 0 : i32
    %26 = arith.cmpi ne, %25, %c0_i32_10 : i32
    scf.if %26 {
      %c0_11 = arith.constant 0 : index
      %c0_12 = arith.constant 0 : index
      %27 = vector.load %arg6[%c0_11, %c0_12] : memref<1x10xf32, #tpu.memory_space<vmem>>, vector<1x10xf32>
      %cst_13 = arith.constant 0.000000e+00 : f32
      %28 = vector.broadcast %cst_13 : f32 to vector<1x10xf32>
      %29 = arith.maximumf %27, %28 : vector<1x10xf32>
      %30 = vector.shape_cast %29 : vector<1x10xf32> to vector<1x1x10xf32>
      %cst_14 = arith.constant dense<0.000000e+00> : vector<1xf32>
      %31 = vector.multi_reduction <add>, %30, %cst_14 [1, 2] : vector<1x1x10xf32> to vector<1xf32>
      %32 = vector.shape_cast %31 : vector<1xf32> to vector<1x1x1xf32>
      %33 = vector.extract %32[0, 0, 0] : f32 from vector<1x1x1xf32>
      %34 = vector.broadcast %33 : f32 to vector<1x1x128xf32>
      %c0_15 = arith.constant 0 : index
      %c0_16 = arith.constant 0 : index
      %c0_17 = arith.constant 0 : index
      %35 = vector.load %arg5[%c0_15, %c0_16, %c0_17] : memref<1x1x128xf32, #tpu.memory_space<vmem>>, vector<1x1x128xf32>
      tpu.vector_store %arg5[%c0_15, %c0_16, %c0_17], %34 {strides = array<i32>} : memref<1x1x128xf32, #tpu.memory_space<vmem>>, vector<1x1x128xf32>,
    } else {
    }
    return
  }
  func.func @transform_0(%arg0: i32, %arg1: i32, %arg2: memref<2xi32, #tpu.memory_space<smem>>) -> (i32, i32, i32) {
    %c0_i32 = arith.constant 0 : i32
    %c0_i32_0 = arith.constant 0 : i32
    %c0_i32_1 = arith.constant 0 : i32
    return %arg0, %c0_i32, %c0_i32_0 : i32, i32, i32
  }
  func.func @transform_1(%arg0: i32, %arg1: i32, %arg2: memref<2xi32, #tpu.memory_space<smem>>) -> (i32, i32, i32) {
    %c0_i32 = arith.constant 0 : i32
    %c0_i32_0 = arith.constant 0 : i32
    return %arg0, %arg1, %c0_i32 : i32, i32, i32
  }
  func.func @transform_2(%arg0: i32, %arg1: i32, %arg2: memref<2xi32, #tpu.memory_space<smem>>) -> (i32, i32, i32) {
    %c0_i32 = arith.constant 0 : i32
    %c0_i32_0 = arith.constant 0 : i32
    %c0_i32_1 = arith.constant 0 : i32
    return %arg0, %c0_i32, %c0_i32_0 : i32, i32, i32
  }
}

</mosaic_0001>

<bundles_post_ra>
// kernel: tpu_custom_call.1
= control target key start
LH: loop header
LB: loop body
LE: loop exit
PB: predicated region body
PF: predicated region fallthrough
CT: control target
= control target key end

     0   :  { %s693_s0 = inlined_call_operand.vmem [shape: s32[2], index: 0, kind: input, shape index: {}]   ;;  %s694_s1 = inlined_call_operand.vmem [shape: f32[2,1,10], index: 1, kind: input, shape index: {}]   ;;  %s695_s2 = inlined_call_operand.vmem [shape: f32[2,32,10], index: 2, kind: input, shape index: {}]   ;;  %s696_s3 = inlined_call_operand.hbm [shape: f32[2,1,128], index: 3, kind: output, shape index: {}]  }
   0x1   :  { %s8_s14 = sshll.u32 %s693_s0, 4  ;;  %s9_s14 = int_to_ptr.vmem [resolvable:$true] %s8_s14 }
   0x2   :  { %s432_s15 = scalar_lea.vmem %s9_s14, 16  ;;  %p437_p1 = scmp.lt.s32.totalorder %s9_s14, %s9_s14 }
   0x3   :  { %p433_p0 = scmp.ne.s32.totalorder %s9_s14, %s432_s15  ;;  %p438_p2 = scmp.lt.s32.totalorder %s432_s15, %s432_s15 }
   0x5   :  { %p439_p3 = por %p438_p2, %p437_p1 }
   0x7   :  { %p440_p4 = pnand %p439_p3, %p433_p0 }
   0x9   :  { %443 = shalt.err (!%p440_p4)  }
   0xa   :  { %s526_s16 = smov [#allocation4]  }
   0xb   :  { %11 = dma.vmem_to_smem %s9_s14, 16, %s526_s16, [#allocation3] }
   0xc   :  { %496 = dma.done.wait [#allocation3], 16 }
   0xd   :  { %497 = vsyncadd [#allocation3], 4294967280 }
   0xe   :  { %13 = sfence }
   0xf   :  { %14 = vsyncpa [#allocation6], 0 }
  0x10   :  { %16 = vsyncpa [#allocation6 + $0x1], 0  ;;  %s551_s17 = smov 0   ;;  %s553_s18 = smov 0  }
  0x11   :  { %s555_s0 = smov 0   ;;  %s557_s19 = smov 0  }
  0x12   :  { %s559_s20 = smov 0   ;;  %s561_s21 = smov 0  }
  0x13 LB: > { %s363_s22 = sadd.s32 4294967295, %s524_s21   ;;  %s364_s23 = sadd.s32 4294967294, %s524_s21   ;;  %s524_s21 = sphi %s561_s21, %s22_s21   ;;  %s520_s20 = sphi %s559_s20, %s705_s20   ;;  %s516_s19 = sphi %s557_s19, %s704_s19   ;;  %s512_s0 = sphi %s555_s0, %s703_s0   ;;  %s508_s18 = sphi %s553_s18, %s702_s18   ;;  %s504_s17 = sphi %s551_s17, %s701_s17  }
  0x14   : > { %s34_s24 = sadd.s32 1, %s520_s20  ;;  %s95_s25 = sadd.s32 1, %s512_s0 }
  0x15   : > { %p36_p5 = scmp.ge.s32.totalorder %s34_s24, 2  ;;  %p105_p6 = scmp.ne.s32.totalorder %s512_s0, %s508_s18 }
  0x16   : > { %p106_p7 = scmp.eq.s32.totalorder %s363_s22, 1  ;;  %p111_p8 = scmp.ne.s32.totalorder %s508_s18, %s504_s17 }
  0x17   : > { %s707_s24 = smov (%p36_p5, %s34_s24), 0  ;;  %p112_p10 = scmp.eq.s32.totalorder %s364_s23, 1 }
  0x18   : > { %p591_p9 = por %p106_p7, %p105_p6  ;;  %s92_s27 = ssub.s32 %s520_s20, %s707_s24 }
  0x19   : > { %p367_p11 = scmp.ge.s32.totalorder %s524_s21, 1  ;;  %p93_p12 = scmp.eq.s32.totalorder %s92_s27, 0 }
  0x1a   : > { %p598_p13 = por %p112_p10, %p111_p8  ;;  %p149_p0 = scmp.lt.s32.totalorder %s524_s21, 3 }
  0x1b   : > { %s604_s29 = scalar_select %p93_p12, %s512_s0, %s95_s25  }
  0x1c   : > { %p150_p1 = pnand %p367_p11, %p149_p0 }
  0x1d   : > { %p177_p2 = scmp.lt.s32.totalorder (!%p150_p1), %s516_s19, 1  ;;  %s190_s30 = sld [smem:[#allocation4 + %s516_s19]] (!%p150_p1)  ;;  %v195_v0 = vlaneseq (!%p150_p1)  ;;  %vm217_vm0 = vcmask (!%p150_p1), 80896   ;;  %vm205_vm2 = vcmask (!%p150_p1), 73728  }
  0x1e   : > { %153 = sbr.rel (%p150_p1) target bundleno = 445 (0x1bd), region = 28  ;;  %s175_s12 = sand.u32 (!%p150_p1), 1, %s508_s18  }
  0x1f   : > { %v196_v1 = vand.u32 (!%p150_p1), 127, %v195_v0  ;;  %s176_s13 = scalar_lea.vmem (!%p150_p1), [#allocation5], %s175_s12  ;;  %s370_s15 = sshll.u32 (!%p150_p1), %s516_s19, 4 }
  0x20   : > { %s285_s14 = sshll.u32 (!%p150_p1), %s176_s13, 4  ;;  %s648_s25 = scalar_lea.hbm (!%p150_p1), %s696_s3, %s370_s15  ;;  %s643_s14 = int_to_ptr.vmem [resolvable:$true] %s285_s14 }
  0x21   : > { %s273_s27 = scalar_lea.sflag (!%p150_p1), [#allocation6], %s175_s12 }
  0x23   : > { %v197_v3 = vstv (!%p150_p1), %s190_s30  ;;  %s444_s30 = scalar_lea.vmem (!%p150_p1), %s643_s14, 16 }
  0x24   : > { %vm615_vm1 = vcmp.eq.s32.totalorder (!%p150_p1), %v196_v1, %v197_v3  ;;  %p445_p3 = scmp.ne.s32.totalorder (!%p150_p1), %s643_s14, %s444_s30 }
  0x25   : > { %s178_s4 = scalar_select %p177_p2, %s516_s19, 1 }
  0x26   : > { %p446_p4 = pnand %p445_p3, %p591_p9  ;;  %s527_s19 = smov [#allocation5]  }
  0x27   : > { %s373_s5 = sshll.u32 %s178_s4, 5  ;;  %s179_s11 = scalar_lea.vmem %s694_s1, %s178_s4 }
  0x28   : > { %s188_s8 = scalar_lea.vmem %s695_s2, %s373_s5  ;;  %v203_v14 = vld [vmem:[%s179_s11] sm:$0x1]  ;;  %p447_p5 = pneg %p446_p4 }
  0x29   : > { %v191_v2 = vld [vmem:[%s188_s8] sm:$0xff]  ;;  %v193_v4 = vld [vmem:[%s188_s8 + $0x10] sm:$0xff]  ;;  %v192_v5 = vld [vmem:[%s188_s8 + $0x8] sm:$0xff]  ;;  %v204_v17 = vsel %vm615_vm1, %v203_v14, 0.0  ;;  %s448_s4 = sshll.u32 %s527_s19, 4  ;;  %s449_s4 = int_to_ptr.vmem [resolvable:$false] %s448_s4 }
  0x2a   : > { %v194_v7 = vld [vmem:[%s188_s8 + $0x18] sm:$0xff]  ;;  %v213_v8 = vsel %vm615_vm1, %v191_v2, 0.0  ;;  %v215_v9 = vsel %vm615_vm1, %v193_v4, 0.0  ;;  %v214_v10 = vsel %vm615_vm1, %v192_v5, 0.0  ;;  %v206_v18 = vsel %vm205_vm2, %v204_v17, 0.0  ;;  %s450_s5 = scalar_lea.vmem %s449_s4, 32  ;;  %p451_p6 = scmp.lt.s32.totalorder %s643_s14, %s449_s4 }
  0x2b   : > { %v216_v11 = vsel %vm615_vm1, %v194_v7, 0.0  ;;  %v218_v12 = vsel %vm217_vm0, %v213_v8, 0.0  ;;  %v224_v13 = vsel %vm217_vm0, %v215_v9, 0.0  ;;  %v221_v15 = vsel %vm217_vm0, %v214_v10, 0.0  ;;  %p452_p7 = scmp.lt.s32.totalorder %s450_s5, %s444_s30 }
  0x2c   : > { %219 = vadd.xlane.f32.xlu0 %v218_v12  ;;  %225 = vadd.xlane.f32.xlu1 %v224_v13  ;;  %v227_v16 = vsel %vm217_vm0, %v216_v11, 0.0 }
  0x2d   : > { %p453_p8 = por %p452_p7, %p451_p6 }
  0x2f   : > { %p454_p10 = pnand %p453_p8, %p447_p5 }
  0x30   : > { %222 = vadd.xlane.f32.xlu0 %v221_v15  ;;  %228 = vadd.xlane.f32.xlu1 %v227_v16 }
  0x34   : > { %207 = vadd.xlane.f32.xlu0 %v206_v18 }
  0xb9   : > { %v220_v19 = vpop.xlane.xlu0 %219  ;;  %v226_v20 = vpop.xlane.xlu1 %225 }
  0xba   : > { %v231_v21 = vsub.f32 %v191_v2, %v220_v19  ;;  %v233_v22 = vsub.f32 %v193_v4, %v226_v20 }
  0xbc   : > { %v235_v25 = vand.u32 2147483647, %v231_v21  ;;  %v237_v28 = vand.u32 2147483647, %v233_v22 }
  0xbd   : > { %v223_v23 = vpop.xlane.xlu0 %222  ;;  %v229_v24 = vpop.xlane.xlu1 %228 }
  0xbe   : > { %v232_v26 = vsub.f32 %v192_v5, %v223_v23  ;;  %v234_v27 = vsub.f32 %v194_v7, %v229_v24  ;;  %v239_v32 = vsel %vm217_vm0, %v235_v25, 0.0  ;;  %v242_v36 = vsel %vm217_vm0, %v237_v28, 0.0 }
  0xc0   : > { %v236_v29 = vand.u32 2147483647, %v232_v26  ;;  %v238_v30 = vand.u32 2147483647, %v234_v27 }
  0xc1   : > { %v208_v31 = vpop.xlane.xlu0 %207 }
  0xc2   : > { %v240_v33 = vsel %vm217_vm0, %v236_v29, 0.0  ;;  %v209_v34 = vsub.f32 %v203_v14, %v208_v31  ;;  %v244_v37 = vsel %vm217_vm0, %v238_v30, 0.0 }
  0xc3   : > { %v241_v35 = vadd.f32 %v240_v33, %v239_v32 }
  0xc4   : > { %210 = vst.msk [vmem:[#allocation2] sm:$0x1] %vm205_vm2, %v209_v34 }
  0xc5   : > { %v243_v38 = vadd.f32 %v242_v36, %v241_v35 }
  0xc7   : > { %v245_v39 = vadd.f32 %v244_v37, %v243_v38 }
  0xc9   : > { %v246_v40 = vrot.slane %v245_v39, 4 }
  0xcb   : > { %v247_v41 = vadd.f32 %v246_v40, %v245_v39  ;;  %v230_v45 = vld [vmem:[#allocation2] sm:$0x1] }
  0xcd   : > { %v248_v42 = vrot.slane %v247_v41, 2 }
  0xcf   : > { %v249_v43 = vadd.f32 %v248_v42, %v247_v41 }
  0xd1   : > { %v250_v44 = vrot.slane %v249_v43, 1 }
  0xd3   : > { %v251_v46 = vadd.f32 %v250_v44, %v249_v43 }
  0xd5   : > { %v252_v47 = vadd.f32 %v251_v46, %v230_v45 }
  0xd7   : > { %254 = vst.msk [vmem:[#allocation2] sm:$0x1] %vm205_vm2, %v252_v47 }
  0xde   : > { %v258_v48 = vld [vmem:[#allocation2] sm:$0x1] }
  0xdf   : > { %v259_v49 = vmax.f32 %v258_v48, 0.0 }
  0xe1   : > { %v260_v50 = vsel %vm205_vm2, %v259_v49, 0.0 }
  0xe2   : > { %261 = vadd.xlane.f32.xlu1 %v260_v50 }
 0x16f   : > { %v262_v51 = vpop.xlane.xlu1 %261 }
 0x170   : > { %v263_v52 = vrot.slane %v262_v51, 4 }
 0x172   : > { %v264_v53 = vadd.f32 %v263_v52, %v262_v51 }
 0x174   : > { %v265_v54 = vrot.slane %v264_v53, 2 }
 0x176   : > { %v266_v55 = vadd.f32 %v265_v54, %v264_v53 }
 0x178   : > { %v267_v56 = vrot.slane %v266_v55, 1 }
 0x17a   : > { %v268_v57 = vadd.f32 %v267_v56, %v266_v55 }
 0x17c   : > { %374 = vpush %v268_v57 }
 0x1ad   : > { %s375_s16 = spop %374 }
 0x1ae   : > { %v270_v58 = vstv %s375_s16 }
 0x1af   : > { %271 = vst [vmem:[%s176_s13] sm:$0x1] %v270_v58 }
 0x1b0   : > { %457 = shalt.err (!%p454_p10)
}
 0x1b1   : > { %s458_s6 = scalar_lea.hbm %s648_s25, 16  ;;  %s462_s9 = scalar_lea.hbm %s696_s3, 32 }
 0x1b2   : > { %p459_p11 = scmp.ne.s32.totalorder %s648_s25, %s458_s6  ;;  %p463_p1 = scmp.lt.u32.totalorder %s648_s25, %s696_s3 }
 0x1b3   : > { %p464_p2 = scmp.lt.u32.totalorder %s462_s9, %s458_s6  ;;  %p466_p4 = scmp.lt.u32.totalorder %s458_s6, %s648_s25 }
 0x1b4   : > { %p460_p12 = pnand %p459_p11, %p591_p9 }
 0x1b5   : > { %p465_p3 = por %p464_p2, %p463_p1 }
 0x1b6   : > { %p461_p0 = pneg %p460_p12 }
 0x1b7   : > { %p467_p5 = por %p466_p4, %p465_p3 }
 0x1b9   : > { %p468_p6 = pnand %p467_p5, %p461_p0 }
 0x1bb   : > { %471 = shalt.err (!%p468_p6)
}
 0x1bc   : > { %376 = dma.vmem_to_hbm [thread:$0]  (%p591_p9), %s643_s14, 16, %s648_s25, %s273_s27  }
 0x1bd PF: > { %p382_p7 = scmp.ge.s32.totalorder %s524_s21, 2  ;;  %s297_s12 = sand.u32 1, %s504_s17  }
 0x1be   : > { %s298_s13 = scalar_lea.sflag [#allocation6], %s297_s12 }
 0x1bf   : > { %p379_p8 = pnand %p382_p7, %p598_p13 }
 0x1c1   : > { %499 = dma.done.wait (!%p379_p8), %s298_s13, 16  }
 0x1c2   : > { %501 = vsyncadd (!%p379_p8), %s298_s13, 4294967280  ;;  %s22_s21 = sadd.s32 1, %s524_s21   ;;  %s701_s17 = smov %s508_s18 }
 0x1c3   : > { %p19_p10 = scmp.ge.s32.totalorder %s22_s21, 4   ;;  %s702_s18 = smov %s512_s0 }
 0x1c4   : > { %s703_s0 = smov %s604_s29  ;;  %s704_s19 = smov %s520_s20 }
 0x1c5   : > { %s705_s20 = smov %s707_s24  ;;  %21 = sbr.rel (!%p19_p10) target bundleno = 19 (0x13), region = 74 }
 0x1cc   :  { %302 = vsyncpa [#allocation6], 1 }
 0x1cd   :  { %304 = vsyncpa [#allocation6 + $0x1], 1 }

</bundles_post_ra>
